<compile_context>
chip_gen: v5e
topology: v5e:2x2
jax: 0.10.0
libtpu: 0.0.40
codegen_flags: <defaults>
</compile_context>

<pallas_src>
import jax
import jax.numpy as jnp
from jax import lax
from jax.experimental import pallas as pl
from jax.experimental.pallas import tpu as pltpu

EPS = 1e-5          # PyTorch BatchNorm2d default
_SUB_TOKENS = 256   # epilogue sub-chunk: bounds f32 accumulator live range


# ------------------------------------------------------------------------------
# Fused kernel: one MXU matmul (3x3 conv as im2col) + folded BN + ReLU per tile.
# ------------------------------------------------------------------------------
def _conv3x3_bn_relu_kernel(cols_ref, w_ref, scale_ref, bias_ref, o_ref):
    # cols_ref : (K, Ttok)   bf16  im2col patches, K = 9*Ci, tokens in lane axis
    # w_ref    : (Co, K)     bf16  flattened conv weight (tap-major, Ci-minor)
    # scale_ref: (Co, 1)     f32   folded BN scale
    # bias_ref : (Co, 1)     f32   folded BN bias (conv bias absorbed)
    # o_ref    : (Co, Ttok)  out   NCHW-layout output tile (channels x tokens)
    Co, Ttok = o_ref.shape
    sub = _SUB_TOKENS if Ttok % _SUB_TOKENS == 0 else Ttok

    w = w_ref[...]
    # hoist broadcasts out of the sub-chunk loop (JAX does not CSE broadcasts)
    scale = jnp.broadcast_to(scale_ref[...], (Co, sub))
    bias = jnp.broadcast_to(bias_ref[...], (Co, sub))

    for s in range(0, Ttok, sub):                         # static, lane-aligned
        acc = jnp.dot(w, cols_ref[:, s:s + sub],
                      preferred_element_type=jnp.float32)  # single MXU dot, K=9*Ci
        y = acc * scale + bias                              # folded eval BN
        o_ref[:, s:s + sub] = jnp.maximum(y, 0.0).astype(o_ref.dtype)  # ReLU


def _pick_token_tile(n_tok, max_tile=1024):
    """Largest multiple-of-128 divisor of n_tok (<= max_tile), else n_tok."""
    best = None
    t = 128
    while t <= min(n_tok, max_tile):
        if n_tok % t == 0:
            best = t
        t += 128
    return best if best is not None else n_tok


# ------------------------------------------------------------------------------
# Wrapper: im2col + BN folding + pallas_call; output is NCHW directly.
# ------------------------------------------------------------------------------
def att_proj_node_forward(x_nchw, conv_w, conv_b, bn_gamma, bn_beta,
                          bn_mean, bn_var, *, out_dtype=jnp.bfloat16, eps=EPS):
    B, Ci, H, W = x_nchw.shape
    Co = conv_w.shape[0]
    K = 9 * Ci
    n_tok = H * W
    Ttok = _pick_token_tile(n_tok)

    # Fold eval-mode BatchNorm (+ conv bias) into per-channel scale / bias.
    scale = (bn_gamma * lax.rsqrt(bn_var + eps)).astype(jnp.float32)
    bias = ((conv_b - bn_mean) * scale + bn_beta).astype(jnp.float32)
    scale = scale.reshape(Co, 1)
    bias = bias.reshape(Co, 1)

    # im2col with zero halo, (K, tokens) orientation, K = tap-major / Ci-minor.
    xb = x_nchw.astype(jnp.bfloat16)
    xp = jnp.pad(xb, ((0, 0), (0, 0), (1, 1), (1, 1)))
    cols = jnp.concatenate(
        [xp[:, :, di:di + H, dj:dj + W] for di in range(3) for dj in range(3)],
        axis=1).reshape(B, K, n_tok)

    # conv weight (Co, Ci, 3, 3) -> (Co, 3, 3, Ci) -> (Co, 9*Ci), matching cols' K.
    w = jnp.transpose(conv_w, (0, 2, 3, 1)).reshape(Co, K).astype(jnp.bfloat16)

    out = pl.pallas_call(
        _conv3x3_bn_relu_kernel,
        out_shape=jax.ShapeDtypeStruct((B, Co, n_tok), out_dtype),
        grid=(B, n_tok // Ttok),
        in_specs=[
            pl.BlockSpec((None, K, Ttok), lambda b, t: (b, 0, t)),
            pl.BlockSpec((Co, K), lambda b, t: (0, 0)),
            pl.BlockSpec((Co, 1), lambda b, t: (0, 0)),
            pl.BlockSpec((Co, 1), lambda b, t: (0, 0)),
        ],
        out_specs=pl.BlockSpec((None, Co, Ttok), lambda b, t: (b, 0, t)),
        compiler_params=pltpu.CompilerParams(
            dimension_semantics=("parallel", "parallel")),
    )(cols, w, scale, bias)

    # (B, Co, H*W) -> (B, Co, H, W): contiguous reshape, no HBM transpose pass.
    return out.reshape(B, Co, H, W)


# ------------------------------------------------------------------------------
# Pure-JAX reference (same math, no Pallas, no im2col) for correctness checks.
# ------------------------------------------------------------------------------
def att_proj_node_ref(x_nchw, conv_w, conv_b, bn_gamma, bn_beta, bn_mean, bn_var,
                      *, eps=EPS):
    y = lax.conv_general_dilated(
        x_nchw.astype(jnp.bfloat16), conv_w.astype(jnp.bfloat16),
        window_strides=(1, 1), padding=((1, 1), (1, 1)),
        dimension_numbers=("NCHW", "OIHW", "NCHW"),
        preferred_element_type=jnp.float32)
    y = y + conv_b[None, :, None, None]
    y = (y - bn_mean[None, :, None, None]) \
        * (bn_gamma / jnp.sqrt(bn_var + eps))[None, :, None, None] \
        + bn_beta[None, :, None, None]
    return jnp.maximum(y, 0.0)


if __name__ == "__main__":
    B, Ci, H, W = 2, 4, 16, 16
    Co = 128                         # cho

    ks = iter(jax.random.split(jax.random.PRNGKey(0), 8))
    x = jax.random.normal(next(ks), (B, Ci, H, W), jnp.float32)
    conv_w = 0.15 * jax.random.normal(next(ks), (Co, Ci, 3, 3), jnp.float32)
    conv_b = 0.10 * jax.random.normal(next(ks), (Co,), jnp.float32)
    bn_gamma = 1.0 + 0.1 * jax.random.normal(next(ks), (Co,), jnp.float32)
    bn_beta = 0.1 * jax.random.normal(next(ks), (Co,), jnp.float32)
    bn_mean = 0.1 * jax.random.normal(next(ks), (Co,), jnp.float32)
    bn_var = 1.0 + 0.1 * jnp.abs(jax.random.normal(next(ks), (Co,), jnp.float32))

    ref = att_proj_node_ref(x, conv_w, conv_b, bn_gamma, bn_beta, bn_mean, bn_var)

    # f32-output path: tight check (bf16 matmul inputs are an intentional
    # precision choice shared with the reference).
    out_f32 = att_proj_node_forward(x, conv_w, conv_b, bn_gamma, bn_beta,
                                    bn_mean, bn_var, out_dtype=jnp.float32)
    out_f32 = jax.block_until_ready(out_f32)
    assert out_f32.shape == (B, Co, H, W)
    assert bool(jnp.all(jnp.isfinite(out_f32)))
    err32 = float(jnp.max(jnp.abs(out_f32 - ref)))
    assert err32 < 2e-3, f"f32 path max abs err vs reference: {err32}"

    # default bf16-output path (half the HBM writeback): looser tolerance for
    # the extra output rounding.
    out_bf16 = att_proj_node_forward(x, conv_w, conv_b, bn_gamma, bn_beta,
                                     bn_mean, bn_var)
    out_bf16 = jax.block_until_ready(out_bf16)
    assert out_bf16.shape == (B, Co, H, W)
    assert bool(jnp.all(jnp.isfinite(out_bf16.astype(jnp.float32))))
    err16 = float(jnp.max(jnp.abs(out_bf16.astype(jnp.float32) - ref)))
    assert err16 < 5e-2, f"bf16 path max abs err vs reference: {err16}"

    print("KERNEL_OK")
</pallas_src>

<mosaic_0001>
module attributes {stable_mosaic.version = 11 : i64} {
  func.func @_conv3x3_bn_relu_kernel(%arg0: i32, %arg1: i32, %arg2: memref<1x36x256xbf16, #tpu.memory_space<vmem>>, %arg3: memref<128x36xbf16, #tpu.memory_space<vmem>>, %arg4: memref<128x1xf32, #tpu.memory_space<vmem>>, %arg5: memref<128x1xf32, #tpu.memory_space<vmem>>, %arg6: memref<1x128x256xf32, #tpu.memory_space<vmem>>) attributes {dimension_semantics = [#tpu.dimension_semantics<parallel>, #tpu.dimension_semantics<parallel>], iteration_bounds = array<i64: 2, 1>, scalar_prefetch = 0 : i64, scratch_operands = 0 : i64, tpu.core_type = #tpu.core_type<tc>, window_params = [{transform_indices = @transform_0, window_bounds = array<i64: 1, 36, 256>}, {pipeline_mode = #tpu.pipeline_mode<synchronous>, transform_indices = @transform_1, window_bounds = array<i64: 128, 36>}, {pipeline_mode = #tpu.pipeline_mode<synchronous>, transform_indices = @transform_2, window_bounds = array<i64: 128, 1>}, {pipeline_mode = #tpu.pipeline_mode<synchronous>, transform_indices = @transform_3, window_bounds = array<i64: 128, 1>}, {transform_indices = @transform_4, window_bounds = array<i64: 1, 128, 256>}]} {
    %c0 = arith.constant 0 : index
    %c0_0 = arith.constant 0 : index
    %0 = vector.load %arg3[%c0, %c0_0] : memref<128x36xbf16, #tpu.memory_space<vmem>>, vector<128x36xbf16>
    %c0_1 = arith.constant 0 : index
    %c0_2 = arith.constant 0 : index
    %1 = vector.load %arg4[%c0_1, %c0_2] : memref<128x1xf32, #tpu.memory_space<vmem>>, vector<128x1xf32>
    %2 = vector.shape_cast %1 : vector<128x1xf32> to vector<128x1xf32>
    %3 = vector.broadcast %2 : vector<128x1xf32> to vector<128x256xf32>
    %c0_3 = arith.constant 0 : index
    %c0_4 = arith.constant 0 : index
    %4 = vector.load %arg5[%c0_3, %c0_4] : memref<128x1xf32, #tpu.memory_space<vmem>>, vector<128x1xf32>
    %5 = vector.shape_cast %4 : vector<128x1xf32> to vector<128x1xf32>
    %6 = vector.broadcast %5 : vector<128x1xf32> to vector<128x256xf32>
    %c0_5 = arith.constant 0 : index
    %c0_6 = arith.constant 0 : index
    %c0_7 = arith.constant 0 : index
    %7 = vector.load %arg2[%c0_5, %c0_6, %c0_7] : memref<1x36x256xbf16, #tpu.memory_space<vmem>>, vector<1x36x256xbf16>
    %8 = vector.shape_cast %7 : vector<1x36x256xbf16> to vector<36x256xbf16>
    %cst = arith.constant dense<0.000000e+00> : vector<128x256xf32>
    %9 = tpu.matmul %0, %8, %cst {dimension_numbers = #tpu.dot_dimension_numbers<[1], [0], [0], [1], [0, 0, 1, 1], [], []>} : vector<128x36xbf16>, vector<36x256xbf16>, vector<128x256xf32> -> vector<128x256xf32>
    %10 = arith.mulf %9, %3 : vector<128x256xf32>
    %11 = arith.addf %10, %6 : vector<128x256xf32>
    %cst_8 = arith.constant 0.000000e+00 : f32
    %12 = vector.broadcast %cst_8 : f32 to vector<128x256xf32>
    %13 = arith.maximumf %11, %12 : vector<128x256xf32>
    %c0_9 = arith.constant 0 : index
    %c0_10 = arith.constant 0 : index
    %c0_11 = arith.constant 0 : index
    %14 = vector.load %arg6[%c0_9, %c0_10, %c0_11] : memref<1x128x256xf32, #tpu.memory_space<vmem>>, vector<1x128x256xf32>
    %15 = vector.shape_cast %14 : vector<1x128x256xf32> to vector<128x256xf32>
    %16 = vector.shape_cast %13 : vector<128x256xf32> to vector<1x128x256xf32>
    tpu.vector_store %arg6[%c0_9, %c0_10, %c0_11], %16 {strides = array<i32>} : memref<1x128x256xf32, #tpu.memory_space<vmem>>, vector<1x128x256xf32>,
    return
  }
  func.func @transform_0(%arg0: i32, %arg1: i32) -> (i32, i32, i32) {
    %c0_i32 = arith.constant 0 : i32
    %c0_i32_0 = arith.constant 0 : i32
    return %arg0, %c0_i32, %arg1 : i32, i32, i32
  }
  func.func @transform_1(%arg0: i32, %arg1: i32) -> (i32, i32) {
    %c0_i32 = arith.constant 0 : i32
    %c0_i32_0 = arith.constant 0 : i32
    %c0_i32_1 = arith.constant 0 : i32
    return %c0_i32, %c0_i32_0 : i32, i32
  }
  func.func @transform_2(%arg0: i32, %arg1: i32) -> (i32, i32) {
    %c0_i32 = arith.constant 0 : i32
    %c0_i32_0 = arith.constant 0 : i32
    %c0_i32_1 = arith.constant 0 : i32
    return %c0_i32, %c0_i32_0 : i32, i32
  }
  func.func @transform_3(%arg0: i32, %arg1: i32) -> (i32, i32) {
    %c0_i32 = arith.constant 0 : i32
    %c0_i32_0 = arith.constant 0 : i32
    %c0_i32_1 = arith.constant 0 : i32
    return %c0_i32, %c0_i32_0 : i32, i32
  }
  func.func @transform_4(%arg0: i32, %arg1: i32) -> (i32, i32, i32) {
    %c0_i32 = arith.constant 0 : i32
    %c0_i32_0 = arith.constant 0 : i32
    return %arg0, %c0_i32, %arg1 : i32, i32, i32
  }
}

</mosaic_0001>

<bundles_post_ra>
// kernel: tpu_custom_call.1
= control target key start
LH: loop header
LB: loop body
LE: loop exit
PB: predicated region body
PF: predicated region fallthrough
CT: control target
= control target key end

     0   :  { %9 = vsyncpa [#allocation3], 0  ;;  %s1465_s0 = inlined_call_operand.vmem [shape: bf16[2,36,256], index: 0, kind: input, shape index: {}]   ;;  %s1466_s1 = inlined_call_operand.vmem [shape: bf16[128,36], index: 1, kind: input, shape index: {}]   ;;  %s1467_s2 = inlined_call_operand.vmem [shape: f32[128,1], index: 2, kind: input, shape index: {}]   ;;  %s1468_s3 = inlined_call_operand.vmem [shape: f32[128,1], index: 3, kind: input, shape index: {}]   ;;  %s1469_s4 = inlined_call_operand.hbm [shape: f32[2,128,256], index: 4, kind: output, shape index: {}]  }
   0x1   :  { %11 = vsyncpa [#allocation3 + $0x1], 0  ;;  %s1126_s15 = smov 0   ;;  %s1128_s16 = smov 0  }
   0x2   :  { %s1130_s17 = smov 0   ;;  %s1132_s18 = smov 0  }
   0x3   :  { %s1134_s19 = smov 0   ;;  %s1136_s20 = smov 0  }
   0x4 LB: > { %s861_s21 = sadd.s32 4294967295, %s1096_s20   ;;  %s862_s22 = sadd.s32 4294967294, %s1096_s20   ;;  %s1096_s20 = sphi %s1136_s20, %s17_s20   ;;  %s1092_s19 = sphi %s1134_s19, %s1476_s19   ;;  %s1088_s18 = sphi %s1132_s18, %s1475_s18   ;;  %s1084_s17 = sphi %s1130_s17, %s1474_s17   ;;  %s1080_s16 = sphi %s1128_s16, %s1473_s16   ;;  %s1076_s15 = sphi %s1126_s15, %s1472_s15  }
   0x5   : > { %s29_s23 = sadd.s32 1, %s1092_s19  ;;  %s129_s24 = sadd.s32 1, %s1084_s17 }
   0x6   : > { %p31_p0 = scmp.ge.s32.totalorder %s29_s23, 2  ;;  %p139_p1 = scmp.ne.s32.totalorder %s1084_s17, %s1080_s16 }
   0x7   : > { %p140_p2 = scmp.eq.s32.totalorder %s861_s21, 1  ;;  %p145_p3 = scmp.ne.s32.totalorder %s1080_s16, %s1076_s15 }
   0x8   : > { %s1478_s23 = smov (%p31_p0, %s29_s23), 0  ;;  %p146_p5 = scmp.eq.s32.totalorder %s862_s22, 1 }
   0x9   : > { %p1166_p4 = por %p140_p2, %p139_p1  ;;  %s124_s26 = ssub.s32 %s1092_s19, %s1478_s23 }
   0xa   : > { %p865_p6 = scmp.ge.s32.totalorder %s1096_s20, 1  ;;  %p127_p7 = scmp.eq.s32.totalorder %s124_s26, 0 }
   0xb   : > { %p1173_p8 = por %p146_p5, %p145_p3  ;;  %p186_p9 = scmp.lt.s32.totalorder %s1096_s20, 3 }
   0xc   : > { %s1179_s28 = scalar_select %p127_p7, %s1084_s17, %s129_s24  }
   0xd   : > { %p187_p10 = pnand %p865_p6, %p186_p9 }
   0xe   : > { %p217_p11 = scmp.lt.s32.totalorder (!%p187_p10), %s1088_s18, 1  ;;  %s213_s8 = sand.u32 (!%p187_p10), 1, %s1080_s16  }
   0xf   : > { %190 = sbr.rel (%p187_p10) target bundleno = 242 (0xf2), region = 36  ;;  %s949_s11 = sshll.u32 (!%p187_p10), %s1088_s18, 8 }
  0x10   : > { %s778_s14 = scalar_lea.hbm (!%p187_p10), %s1469_s4, %s949_s11  ;;  %s765_s22 = scalar_lea.sflag (!%p187_p10), [#allocation3], %s213_s8 }
  0x11   : > { %s781_s21 = sshll.u32 (!%p187_p10), %s778_s14, 4  ;;  %s1038_s5 = scalar_lea.hbm (!%p187_p10), %s1469_s4, 512  ;;  %s782_s21 = int_to_ptr.hbm [resolvable:$true] %s781_s21 }
  0x12   : > { %s1032_s24 = sshra.s32 (!%p187_p10), %s782_s21, 4  ;;  %s1033_s24 = int_to_ptr.hbm [resolvable:$true] %s1032_s24 }
  0x13   : > { %s1034_s26 = scalar_lea.hbm (!%p187_p10), %s1033_s24, 256  ;;  %p1039_p1 = scmp.lt.s32.totalorder (!%p187_p10), %s1033_s24, %s1469_s4 }
  0x14   : > { %v248_v0 = vld [vmem:[%s1467_s2 + $0x20] sm:$0xff]  ;;  %v246_v1 = vld [vmem:[%s1467_s2 + $0x10] sm:$0xff]  ;;  %v1098_v3 = vmov 0   ;;  %s218_s9 = scalar_select %p217_p11, %s1088_s18, 1  ;;  %v249_v4 = vld [vmem:[%s1467_s2 + $0x28] sm:$0xff]  ;;  %vm531_vm0 = vcmask 1041408  }
  0x15   : > { %v244_v2 = vld [vmem:[%s1467_s2] sm:$0xff]  ;;  %1017 = vset.pattern.permute.xlu2 %v1098_v3  ;;  %1016 = vset.pattern.permute.xlu1 %v1098_v3  ;;  %v247_v6 = vld [vmem:[%s1467_s2 + $0x18] sm:$0xff]  ;;  %v245_v7 = vld [vmem:[%s1467_s2 + $0x8] sm:$0xff]  ;;  %vm506_vm1 = vcmask 293888   ;;  %p1035_p12 = scmp.ne.s32.totalorder %s1033_s24, %s1034_s26  ;;  %p1040_p2 = scmp.lt.s32.totalorder %s1038_s5, %s1034_s26 }
  0x16   : > { %1015 = vset.pattern.permute.xlu0 %v1098_v3  ;;  %282 = vperm.xlu2 %1017, %v248_v0   ;;  %s956_s10 = smul.u32 40, %s218_s9  ;;  %v252_v24 = vld [vmem:[%s1467_s2 + $0x40] sm:$0xff]  ;;  %v251_v25 = vld [vmem:[%s1467_s2 + $0x38] sm:$0xff]  ;;  %v250_v26 = vld [vmem:[%s1467_s2 + $0x30] sm:$0xff]  ;;  %s866_s9 = sshll.u32 %s213_s8, 8 }
  0x17   : > { %272 = vperm.xlu1 %1016, %v246_v1   ;;  %262 = vperm.xlu0 %1015, %v244_v2   ;;  %v937_v29 = vld [vmem:[%s1466_s1] sm:$0xff]  ;;  %v255_v31 = vld [vmem:[%s1467_s2 + $0x58] sm:$0xff]  ;;  %v254_v32 = vld [vmem:[%s1467_s2 + $0x50] sm:$0xff]  ;;  %p1036_p13 = pnand %p1035_p12, %p1166_p4  ;;  %p1041_p3 = por %p1040_p2, %p1039_p1 }
  0x18   : > { %s224_s13 = scalar_lea.vmem %s1465_s0, %s956_s10  ;;  %v941_v30 = vld [vmem:[%s1466_s1 + $0x20] sm:$0xff]  ;;  %v253_v33 = vld [vmem:[%s1467_s2 + $0x48] sm:$0xff]  ;;  %v258_v34 = vld [vmem:[%s1467_s2 + $0x70] sm:$0xff]  ;;  %s1353_s10 = scalar_lea.vmem [#allocation2], %s866_s9 }
  0x19   : > { %v440_v5 = vld [vmem:[%s224_s13 + $0x20] sm:$0x33]  ;;  %v910_v12 = vld [vmem:[%s224_s13 + $0x10] sm:$0xf]  ;;  %v948_v13 = vld [vmem:[%s224_s13 + $0x14] sm:$0xf0]  ;;  %p1037_p0 = pneg %p1036_p13 }
  0x1a   : > { %v494_v8 = vunpack.c.l.b16 %v440_v5  ;;  %v495_v9 = vunpack.c.h.b16 %v440_v5  ;;  %v947_v14 = vld [vmem:[%s224_s13 + $0x14] sm:$0xf]  ;;  %v912_v15 = vld [vmem:[%s224_s13 + $0x18] sm:$0xf0]  ;;  %v911_v18 = vor.u32 %v948_v13, %v910_v12  ;;  %v902_v20 = vld [vmem:[%s224_s13] sm:$0xf] }
  0x1b   : > { %v915_v19 = vor.u32 %v947_v14, %v912_v15  ;;  %v946_v21 = vld [vmem:[%s224_s13 + $0x4] sm:$0xf0]  ;;  %v945_v22 = vld [vmem:[%s224_s13 + $0x4] sm:$0xf]  ;;  %v904_v23 = vld [vmem:[%s224_s13 + $0x8] sm:$0xf0]  ;;  %p1042_p5 = pnand %p1041_p3, %p1037_p0 }
  0x1c   : > { %v500_v10 = vpack.c.b16 %v494_v8, %v494_v8  ;;  %v501_v11 = vpack.c.b16 %v495_v9, %v495_v9  ;;  %v903_v27 = vor.u32 %v946_v21, %v902_v20  ;;  %v907_v28 = vor.u32 %v945_v22, %v904_v23  ;;  %v257_v35 = vld [vmem:[%s1467_s2 + $0x68] sm:$0xff]  ;;  %v256_v36 = vld [vmem:[%s1467_s2 + $0x60] sm:$0xff]  ;;  %v259_v41 = vld [vmem:[%s1467_s2 + $0x78] sm:$0xff]  ;;  %s779_s18 = sshll.u32 %s1353_s10, 4  ;;  %s780_s18 = int_to_ptr.vmem [resolvable:$true] %s779_s18 }
  0x1d   : > { %v938_v37 = vld [vmem:[%s1466_s1 + $0x8] sm:$0xff]  ;;  %v340_v40 = vld [vmem:[%s1468_s3] sm:$0xff]  ;;  %v343_v43 = vld [vmem:[%s1468_s3 + $0x18] sm:$0xff] }
  0x1e   : > { %287 = vperm.xlu2 %1017, %v249_v4   ;;  %v533_v16 = vsel %vm531_vm0, %v500_v10, 0  ;;  %v536_v17 = vsel %vm531_vm0, %v501_v11, 0  ;;  %v942_v38 = vld [vmem:[%s1466_s1 + $0x28] sm:$0xff]  ;;  %v344_v42 = vld [vmem:[%s1468_s3 + $0x20] sm:$0xff]  ;;  %v342_v44 = vld [vmem:[%s1468_s3 + $0x10] sm:$0xff] }
  0x1f   : > { %277 = vperm.xlu1 %1016, %v247_v6   ;;  %267 = vperm.xlu0 %1015, %v245_v7   ;;  %v341_v39 = vld [vmem:[%s1468_s3 + $0x8] sm:$0xff]  ;;  %v939_v45 = vld [vmem:[%s1466_s1 + $0x10] sm:$0xff]  ;;  %v347_v47 = vld [vmem:[%s1468_s3 + $0x38] sm:$0xff] }
  0x20   : > { %543 = vmatpush.bf16.msra.mxu0 %v533_v16  ;;  %950 = vmatpush.bf16.msra.mxu2 %v533_v16  ;;  %v943_v46 = vld [vmem:[%s1466_s1 + $0x30] sm:$0xff]  ;;  %v345_v49 = vld [vmem:[%s1468_s3 + $0x28] sm:$0xff]  ;;  %v348_v52 = vld [vmem:[%s1468_s3 + $0x40] sm:$0xff] }
  0x21   : > { %592 = vmatpush.bf16.msra.mxu1 %v536_v17  ;;  %953 = vmatpush.bf16.msra.mxu3 %v536_v17  ;;  %v346_v48 = vld [vmem:[%s1468_s3 + $0x30] sm:$0xff]  ;;  %v349_v51 = vld [vmem:[%s1468_s3 + $0x48] sm:$0xff]  ;;  %v940_v53 = vld [vmem:[%s1466_s1 + $0x18] sm:$0xff] }
  0x22   : > { %v350_v50 = vld [vmem:[%s1468_s3 + $0x50] sm:$0xff]  ;;  %v944_v54 = vld [vmem:[%s1466_s1 + $0x38] sm:$0xff]  ;;  %v353_v55 = vld [vmem:[%s1468_s3 + $0x68] sm:$0xff] }
  0x23   : > { %v352_v56 = vld [vmem:[%s1468_s3 + $0x60] sm:$0xff]  ;;  %v351_v57 = vld [vmem:[%s1468_s3 + $0x58] sm:$0xff]  ;;  %v354_v59 = vld [vmem:[%s1468_s3 + $0x70] sm:$0xff] }
  0x24   : > { %544 = vmatpush.bf16.msra.mxu0 %v911_v18  ;;  %951 = vmatpush.bf16.msra.mxu2 %v911_v18  ;;  %v355_v58 = vld [vmem:[%s1468_s3 + $0x78] sm:$0xff] }
  0x25   : > { %593 = vmatpush.bf16.msra.mxu1 %v915_v19  ;;  %954 = vmatpush.bf16.msra.mxu3 %v915_v19 }
  0x26   : > { %302 = vperm.xlu2 %1017, %v252_v24  }
  0x27   : > { %297 = vperm.xlu1 %1016, %v251_v25   ;;  %292 = vperm.xlu0 %1015, %v250_v26  }
  0x28   : > { %545 = vmatpush.bf16.msra.mxu0 %v903_v27  ;;  %952 = vmatpush.bf16.msra.mxu2 %v903_v27 }
  0x29   : > { %594 = vmatpush.bf16.msra.mxu1 %v907_v28  ;;  %955 = vmatpush.bf16.msra.mxu3 %v907_v28 }
  0x2b   : > { %916 = vmatmul.msk.bf16.vlgmr.msra.gmra.mxu0 %vm506_vm1, %v937_v29  ;;  %920 = vmatmul.msk.bf16.vlgmr.msra.gmra.mxu2 %vm506_vm1, %v941_v30 }
  0x2c   : > { %924 = vmatmul.msk.bf16.vlgmr.msra.gmra.mxu1 %vm506_vm1, %v937_v29  ;;  %928 = vmatmul.msk.bf16.vlgmr.msra.gmra.mxu3 %vm506_vm1, %v941_v30 }
  0x2e   : > { %317 = vperm.xlu2 %1017, %v255_v31  }
  0x2f   : > { %312 = vperm.xlu1 %1016, %v254_v32   ;;  %307 = vperm.xlu0 %1015, %v253_v33  }
  0x36   : > { %332 = vperm.xlu2 %1017, %v258_v34  }
  0x37   : > { %327 = vperm.xlu1 %1016, %v257_v35   ;;  %322 = vperm.xlu0 %1015, %v256_v36  }
  0x3b   : > { %917 = vmatmul.msk.bf16.gmra.mxu0 %vm506_vm1, %v938_v37  ;;  %921 = vmatmul.msk.bf16.gmra.mxu2 %vm506_vm1, %v942_v38 }
  0x3c   : > { %925 = vmatmul.msk.bf16.gmra.mxu1 %vm506_vm1, %v938_v37  ;;  %929 = vmatmul.msk.bf16.gmra.mxu3 %vm506_vm1, %v942_v38 }
  0x3e   : > { %363 = vperm.xlu2 %1017, %v341_v39  }
  0x3f   : > { %358 = vperm.xlu1 %1016, %v340_v40   ;;  %337 = vperm.xlu0 %1015, %v259_v41  }
  0x46   : > { %378 = vperm.xlu2 %1017, %v344_v42  }
  0x47   : > { %373 = vperm.xlu1 %1016, %v343_v43   ;;  %368 = vperm.xlu0 %1015, %v342_v44  }
  0x4b   : > { %918 = vmatmul.msk.bf16.gmra.mxu0 %vm506_vm1, %v939_v45  ;;  %922 = vmatmul.msk.bf16.gmra.mxu2 %vm506_vm1, %v943_v46 }
  0x4c   : > { %926 = vmatmul.msk.bf16.gmra.mxu1 %vm506_vm1, %v939_v45  ;;  %930 = vmatmul.msk.bf16.gmra.mxu3 %vm506_vm1, %v943_v46 }
  0x4e   : > { %393 = vperm.xlu2 %1017, %v347_v47  }
  0x4f   : > { %388 = vperm.xlu1 %1016, %v346_v48   ;;  %383 = vperm.xlu0 %1015, %v345_v49  }
  0x56   : > { %408 = vperm.xlu2 %1017, %v350_v50  }
  0x57   : > { %403 = vperm.xlu1 %1016, %v349_v51   ;;  %398 = vperm.xlu0 %1015, %v348_v52  }
  0x5b   : > { %919 = vmatmul.msk.bf16.gmra.mxu0 %vm506_vm1, %v940_v53  ;;  %923 = vmatmul.msk.bf16.gmra.mxu2 %vm506_vm1, %v944_v54 }
  0x5c   : > { %927 = vmatmul.msk.bf16.gmra.mxu1 %vm506_vm1, %v940_v53  ;;  %931 = vmatmul.msk.bf16.gmra.mxu3 %vm506_vm1, %v944_v54 }
  0x5e   : > { %423 = vperm.xlu2 %1017, %v353_v55  }
  0x5f   : > { %418 = vperm.xlu1 %1016, %v352_v56   ;;  %413 = vperm.xlu0 %1015, %v351_v57  }
  0x67   : > { %433 = vperm.xlu1 %1016, %v355_v58   ;;  %428 = vperm.xlu0 %1015, %v354_v59  }
  0x70   : > { %v1322_v60 = vpop.permute.xlu2 %282 }
  0x78   : > { %v1324_v61 = vpop.permute.xlu2 %287 }
  0x80   : > { %v1326_v62 = vpop.permute.xlu2 %302 }
  0x88   : > { %v1328_v1 = vpop.permute.xlu2 %317 }
  0x89   : > { %v273_v63 = vpop.permute.xlu1 %272  ;;  %v263_v0 = vpop.permute.xlu0 %262 }
  0x90   : > { %v1332_v4 = vpop.permute.xlu2 %332 }
  0x91   : > { %v1330_v2 = vpop.permute.xlu1 %277  ;;  %v268_v3 = vpop.permute.xlu0 %267 }
  0x98   : > { %v364_v9 = vpop.permute.xlu2 %363 }
  0x99   : > { %v1334_v5 = vpop.permute.xlu1 %297  ;;  %v1336_v6 = vpop.permute.xlu0 %292 }
  0xa0   : > { %v1344_v14 = vpop.permute.xlu2 %378 }
  0xa1   : > { %v313_v7 = vpop.permute.xlu1 %312  ;;  %v1338_v8 = vpop.permute.xlu0 %307 }
  0xa8   : > { %v547_v12 = vpop.f32.mrf.mxu0  ;;  %v1356_v31 = vpop.permute.xlu2 %393 }
  0xa9   : > { %v1340_v10 = vpop.permute.xlu1 %327  ;;  %v1342_v11 = vpop.permute.xlu0 %322  ;;  %v636_v16 = vmul.f32 %v547_v12, %v263_v0 }
  0xaa   : > { %v596_v13 = vpop.f32.mrf.mxu1 }
  0xab   : > { %v637_v17 = vmul.f32 %v596_v13, %v263_v0 }
  0xae   : > { %v1347_v15 = vpop.f32.mrf.mxu2 }
  0xaf   : > { %v616_v18 = vpop.f32.mrf.mxu3 }
  0xb0   : > { %v549_v23 = vpop.f32.mrf.mxu0  ;;  %v409_v49 = vpop.permute.xlu2 %408 }
  0xb1   : > { %v359_v19 = vpop.permute.xlu1 %358  ;;  %v1351_v22 = vpop.permute.xlu0 %337  ;;  %v638_v24 = vmul.f32 %v549_v23, %v268_v3 }
  0xb2   : > { %v668_v20 = vadd.f32 %v636_v16, %v359_v19  ;;  %v669_v21 = vadd.f32 %v637_v17, %v359_v19  ;;  %v598_v25 = vpop.f32.mrf.mxu1  ;;  %v652_v19 = vmul.f32 %v1347_v15, %v1326_v62 }
  0xb3   : > { %v639_v28 = vmul.f32 %v598_v25, %v268_v3  ;;  %v670_v29 = vadd.f32 %v638_v24, %v364_v9 }
  0xb4   : > { %v700_v26 = vmax.f32 %v668_v20, 0.0  ;;  %v701_v27 = vmax.f32 %v669_v21, 0.0  ;;  %v653_v20 = vmul.f32 %v616_v18, %v1326_v62 }
  0xb5   : > { %v671_v30 = vadd.f32 %v639_v28, %v364_v9  ;;  %v702_v32 = vmax.f32 %v670_v29, 0.0 }
  0xb6   : > { %732 = vst [vmem:[%s1353_s10] sm:$0xff] %v700_v26  ;;  %v569_v33 = vpop.f32.mrf.mxu2 }
  0xb7   : > { %733 = vst [vmem:[%s1353_s10 + $0x8] sm:$0xff] %v701_v27  ;;  %v703_v34 = vmax.f32 %v671_v30, 0.0  ;;  %v618_v35 = vpop.f32.mrf.mxu3  ;;  %v654_v12 = vmul.f32 %v569_v33, %v1338_v8 }
  0xb8   : > { %734 = vst [vmem:[%s1353_s10 + $0x10] sm:$0xff] %v702_v32  ;;  %v552_v38 = vpop.f32.mrf.mxu0  ;;  %v655_v13 = vmul.f32 %v618_v35, %v1338_v8 }
  0xb9   : > { %v374_v36 = vpop.permute.xlu1 %373  ;;  %735 = vst [vmem:[%s1353_s10 + $0x18] sm:$0xff] %v703_v34  ;;  %v369_v37 = vpop.permute.xlu0 %368  ;;  %v640_v39 = vmul.f32 %v552_v38, %v273_v63 }
  0xba   : > { %v601_v40 = vpop.f32.mrf.mxu1 }
  0xbb   : > { %v641_v41 = vmul.f32 %v601_v40, %v273_v63  ;;  %v672_v42 = vadd.f32 %v640_v39, %v369_v37 }
  0xbd   : > { %v673_v43 = vadd.f32 %v641_v41, %v369_v37  ;;  %v704_v44 = vmax.f32 %v672_v42, 0.0 }
  0xbe   : > { %v572_v45 = vpop.f32.mrf.mxu2 }
  0xbf   : > { %v705_v46 = vmax.f32 %v673_v43, 0.0  ;;  %v656_v47 = vmul.f32 %v572_v45, %v313_v7  ;;  %v621_v48 = vpop.f32.mrf.mxu3  ;;  %736 = vst [vmem:[%s1353_s10 + $0x20] sm:$0xff] %v704_v44 }
  0xc0   : > { %v657_v50 = vmul.f32 %v621_v48, %v313_v7  ;;  %v554_v54 = vpop.f32.mrf.mxu0 }
  0xc1   : > { %v1362_v51 = vpop.permute.xlu1 %388  ;;  %737 = vst [vmem:[%s1353_s10 + $0x28] sm:$0xff] %v705_v46  ;;  %v688_v52 = vadd.f32 %v656_v47, %v409_v49  ;;  %v1365_v53 = vpop.permute.xlu0 %383  ;;  %v642_v56 = vmul.f32 %v554_v54, %v1330_v2 }
  0xc2   : > { %v689_v55 = vadd.f32 %v657_v50, %v409_v49  ;;  %v603_v57 = vpop.f32.mrf.mxu1 }
  0xc3   : > { %v720_v58 = vmax.f32 %v688_v52, 0.0  ;;  %v643_v59 = vmul.f32 %v603_v57, %v1330_v2  ;;  %v674_v0 = vadd.f32 %v642_v56, %v374_v36 }
  0xc4   : > { %v721_v63 = vmax.f32 %v689_v55, 0.0 }
  0xc5   : > { %752 = vst [vmem:[%s1353_s10 + $0xa0] sm:$0xff] %v720_v58  ;;  %v675_v3 = vadd.f32 %v643_v59, %v374_v36  ;;  %v706_v7 = vmax.f32 %v674_v0, 0.0 }
  0xc6   : > { %753 = vst [vmem:[%s1353_s10 + $0xa8] sm:$0xff] %v721_v63  ;;  %v574_v9 = vpop.f32.mrf.mxu2 }
  0xc7   : > { %v707_v16 = vmax.f32 %v675_v3, 0.0  ;;  %v623_v17 = vpop.f32.mrf.mxu3  ;;  %738 = vst [vmem:[%s1353_s10 + $0x30] sm:$0xff] %v706_v7  ;;  %v658_v39 = vmul.f32 %v574_v9, %v1328_v1 }
  0xc8   : > { %v557_v25 = vpop.f32.mrf.mxu0 }
  0xc9   : > { %v404_v2 = vpop.permute.xlu1 %403  ;;  %739 = vst [vmem:[%s1353_s10 + $0x38] sm:$0xff] %v707_v16  ;;  %v399_v24 = vpop.permute.xlu0 %398  ;;  %v644_v8 = vmul.f32 %v557_v25, %v1322_v60 }
  0xca   : > { %v686_v21 = vadd.f32 %v654_v12, %v404_v2  ;;  %v687_v23 = vadd.f32 %v655_v13, %v404_v2  ;;  %v684_v26 = vadd.f32 %v652_v19, %v399_v24  ;;  %v685_v27 = vadd.f32 %v653_v20, %v399_v24  ;;  %v606_v28 = vpop.f32.mrf.mxu1 }
  0xcb   : > { %v645_v62 = vmul.f32 %v606_v28, %v1322_v60  ;;  %v676_v32 = vadd.f32 %v644_v8, %v1344_v14  ;;  %v659_v60 = vmul.f32 %v623_v17, %v1328_v1 }
  0xcc   : > { %v718_v29 = vmax.f32 %v686_v21, 0.0  ;;  %v719_v30 = vmax.f32 %v687_v23, 0.0  ;;  %v716_v15 = vmax.f32 %v684_v26, 0.0  ;;  %v717_v18 = vmax.f32 %v685_v27, 0.0 }
  0xcd   : > { %v677_v33 = vadd.f32 %v645_v62, %v1344_v14  ;;  %v708_v34 = vmax.f32 %v676_v32, 0.0 }
  0xce   : > { %750 = vst [vmem:[%s1353_s10 + $0x90] sm:$0xff] %v718_v29  ;;  %v577_v35 = vpop.f32.mrf.mxu2 }
  0xcf   : > { %751 = vst [vmem:[%s1353_s10 + $0x98] sm:$0xff] %v719_v30  ;;  %v709_v36 = vmax.f32 %v677_v33, 0.0  ;;  %v660_v37 = vmul.f32 %v577_v35, %v1342_v11  ;;  %v626_v38 = vpop.f32.mrf.mxu3 }
  0xd0   : > { %748 = vst [vmem:[%s1353_s10 + $0x80] sm:$0xff] %v716_v15  ;;  %v661_v40 = vmul.f32 %v626_v38, %v1342_v11  ;;  %v559_v43 = vpop.f32.mrf.mxu0 }
  0xd1   : > { %749 = vst [vmem:[%s1353_s10 + $0x88] sm:$0xff] %v717_v18  ;;  %v419_v41 = vpop.permute.xlu1 %418  ;;  %v414_v42 = vpop.permute.xlu0 %413  ;;  %v646_v47 = vmul.f32 %v559_v43, %v1324_v61 }
  0xd2   : > { %740 = vst [vmem:[%s1353_s10 + $0x40] sm:$0xff] %v708_v34  ;;  %v692_v14 = vadd.f32 %v660_v37, %v419_v41  ;;  %v693_v44 = vadd.f32 %v661_v40, %v419_v41  ;;  %v690_v45 = vadd.f32 %v658_v39, %v414_v42  ;;  %v691_v46 = vadd.f32 %v659_v60, %v414_v42  ;;  %v608_v48 = vpop.f32.mrf.mxu1 }
  0xd3   : > { %741 = vst [vmem:[%s1353_s10 + $0x48] sm:$0xff] %v709_v36  ;;  %v647_v1 = vmul.f32 %v608_v48, %v1324_v61  ;;  %v678_v54 = vadd.f32 %v646_v47, %v1365_v53  ;;  %v424_v61 = vpop.permute.xlu2 %423 }
  0xd4   : > { %v724_v49 = vmax.f32 %v692_v14, 0.0  ;;  %v725_v11 = vmax.f32 %v693_v44, 0.0  ;;  %v722_v50 = vmax.f32 %v690_v45, 0.0  ;;  %v723_v52 = vmax.f32 %v691_v46, 0.0 }
  0xd5   : > { %v679_v55 = vadd.f32 %v647_v1, %v1365_v53  ;;  %v710_v56 = vmax.f32 %v678_v54, 0.0 }
  0xd6   : > { %756 = vst [vmem:[%s1353_s10 + $0xc0] sm:$0xff] %v724_v49  ;;  %v579_v57 = vpop.f32.mrf.mxu2 }
  0xd7   : > { %757 = vst [vmem:[%s1353_s10 + $0xc8] sm:$0xff] %v725_v11  ;;  %v711_v58 = vmax.f32 %v679_v55, 0.0  ;;  %v662_v59 = vmul.f32 %v579_v57, %v1340_v10  ;;  %v628_v63 = vpop.f32.mrf.mxu3 }
  0xd8   : > { %754 = vst [vmem:[%s1353_s10 + $0xb0] sm:$0xff] %v722_v50  ;;  %v663_v0 = vmul.f32 %v628_v63, %v1340_v10  ;;  %v562_v7 = vpop.f32.mrf.mxu0 }
  0xd9   : > { %755 = vst [vmem:[%s1353_s10 + $0xb8] sm:$0xff] %v723_v52  ;;  %v694_v3 = vadd.f32 %v662_v59, %v424_v61  ;;  %v648_v53 = vmul.f32 %v562_v7, %v1336_v6  ;;  %v429_v25 = vpop.permute.xlu0 %428  ;;  %v434_v35 = vpop.permute.xlu1 %433 }
  0xda   : > { %742 = vst [vmem:[%s1353_s10 + $0x50] sm:$0xff] %v710_v56  ;;  %v695_v9 = vadd.f32 %v663_v0, %v424_v61  ;;  %v611_v12 = vpop.f32.mrf.mxu1 }
  0xdb   : > { %743 = vst [vmem:[%s1353_s10 + $0x58] sm:$0xff] %v711_v58  ;;  %v726_v13 = vmax.f32 %v694_v3, 0.0  ;;  %v649_v16 = vmul.f32 %v611_v12, %v1336_v6  ;;  %v680_v19 = vadd.f32 %v648_v53, %v1362_v51 }
  0xdc   : > { %v727_v17 = vmax.f32 %v695_v9, 0.0 }
  0xdd   : > { %758 = vst [vmem:[%s1353_s10 + $0xd0] sm:$0xff] %v726_v13  ;;  %v681_v20 = vadd.f32 %v649_v16, %v1362_v51  ;;  %v712_v10 = vmax.f32 %v680_v19, 0.0 }
  0xde   : > { %759 = vst [vmem:[%s1353_s10 + $0xd8] sm:$0xff] %v727_v17  ;;  %v582_v2 = vpop.f32.mrf.mxu2 }
  0xdf   : > { %v713_v21 = vmax.f32 %v681_v20, 0.0  ;;  %v664_v23 = vmul.f32 %v582_v2, %v1332_v4  ;;  %v631_v24 = vpop.f32.mrf.mxu3  ;;  %744 = vst [vmem:[%s1353_s10 + $0x60] sm:$0xff] %v712_v10 }
  0xe0   : > { %v665_v6 = vmul.f32 %v631_v24, %v1332_v4  ;;  %v564_v27 = vpop.f32.mrf.mxu0 }
  0xe1   : > { %745 = vst [vmem:[%s1353_s10 + $0x68] sm:$0xff] %v713_v21  ;;  %v696_v26 = vadd.f32 %v664_v23, %v429_v25  ;;  %v650_v51 = vmul.f32 %v564_v27, %v1334_v5 }
  0xe2   : > { %v697_v8 = vadd.f32 %v665_v6, %v429_v25  ;;  %v613_v28 = vpop.f32.mrf.mxu1 }
  0xe3   : > { %v728_v29 = vmax.f32 %v696_v26, 0.0  ;;  %v651_v30 = vmul.f32 %v613_v28, %v1334_v5  ;;  %v682_v15 = vadd.f32 %v650_v51, %v1356_v31 }
  0xe4   : > { %v729_v62 = vmax.f32 %v697_v8, 0.0 }
  0xe5   : > { %760 = vst [vmem:[%s1353_s10 + $0xe0] sm:$0xff] %v728_v29  ;;  %v683_v4 = vadd.f32 %v651_v30, %v1356_v31  ;;  %v714_v18 = vmax.f32 %v682_v15, 0.0 }
  0xe6   : > { %761 = vst [vmem:[%s1353_s10 + $0xe8] sm:$0xff] %v729_v62  ;;  %v584_v32 = vpop.f32.mrf.mxu2 }
  0xe7   : > { %v715_v33 = vmax.f32 %v683_v4, 0.0  ;;  %v666_v34 = vmul.f32 %v584_v32, %v1351_v22  ;;  %v633_v5 = vpop.f32.mrf.mxu3  ;;  %746 = vst [vmem:[%s1353_s10 + $0x70] sm:$0xff] %v714_v18 }
  0xe8   : > { %v667_v36 = vmul.f32 %v633_v5, %v1351_v22 }
  0xe9   : > { %747 = vst [vmem:[%s1353_s10 + $0x78] sm:$0xff] %v715_v33  ;;  %v698_v31 = vadd.f32 %v666_v34, %v434_v35 }
  0xea   : > { %v699_v37 = vadd.f32 %v667_v36, %v434_v35 }
  0xeb   : > { %v730_v38 = vmax.f32 %v698_v31, 0.0 }
  0xec   : > { %v731_v39 = vmax.f32 %v699_v37, 0.0 }
  0xed   : > { %762 = vst [vmem:[%s1353_s10 + $0xf0] sm:$0xff] %v730_v38 }
  0xee   : > { %763 = vst [vmem:[%s1353_s10 + $0xf8] sm:$0xff] %v731_v39 }
  0xef   : > { %1045 = shalt.err (!%p1042_p5)
}
  0xf0   : > { %s1099_s8 = smov 256   ;;  %s1100_s9 = smov 16  }
  0xf1   : > { %957 = dma.vmem_to_hbm [thread:$0]  (%p1166_p4), %s780_s18, 4096, %s782_s21, %s765_s22, %s1099_s8, %s1099_s8, %s1100_s9  }
  0xf2 PF: > { %p963_p6 = scmp.ge.s32.totalorder %s1096_s20, 2  ;;  %s796_s10 = sand.u32 1, %s1076_s15  }
  0xf3   : > { %s797_s11 = scalar_lea.sflag [#allocation3], %s796_s10 }
  0xf4   : > { %p960_p7 = pnand %p963_p6, %p1173_p8 }
  0xf6   : > { %p961_p9 = pneg %p960_p7 }
  0xf8   : > { %1071 = dma.done.wait (%p961_p9), %s797_s11, 4096  }
  0xf9   : > { %1073 = vsyncadd (%p961_p9), %s797_s11, 4294963200  ;;  %s17_s20 = sadd.s32 1, %s1096_s20   ;;  %s1472_s15 = smov %s1080_s16 }
  0xfa   : > { %p14_p10 = scmp.ge.s32.totalorder %s17_s20, 4   ;;  %s1473_s16 = smov %s1084_s17 }
  0xfb   : > { %s1474_s17 = smov %s1179_s28  ;;  %s1475_s18 = smov %s1092_s19 }
  0xfc   : > { %s1476_s19 = smov %s1478_s23  ;;  %16 = sbr.rel (!%p14_p10) target bundleno = 4 (0x4), region = 71 }
 0x101   :  { %803 = vsyncpa [#allocation3], 1 }
 0x102   :  { %805 = vsyncpa [#allocation3 + $0x1], 1 }

</bundles_post_ra>
